<compile_context>
chip_gen: v7x
topology: tpu7x:2x2x1
jax: 0.10.0
libtpu: 0.0.40
codegen_flags: <defaults>
</compile_context>

<pallas_src>
import functools

import jax
import jax.numpy as jnp
from jax.experimental import pallas as pl
from jax.experimental.pallas import tpu as pltpu

EPS = 1e-6


def _round_up(v, m):
    return (v + m - 1) // m * m


def _pick_tn(feat_pad):
    """N-tile width for the (F, F) weight: full F for modest sizes, else <=1024."""
    if feat_pad <= 2048:
        return feat_pad
    for cand in (1024, 512, 256, 128):
        if feat_pad % cand == 0:
            return cand
    return feat_pad  # unreachable: feat_pad is a multiple of 128


def _sublayer_connection_kernel(x_ref, a2_ref, b2_ref, w_ref, wb_ref, *rest,
                                feat, apply_dropout, approx_recip):
    if apply_dropout:
        mask_ref, o_ref, y_ref = rest
    else:
        o_ref, y_ref = rest
        mask_ref = None

    j = pl.program_id(1)
    feat_pad = x_ref.shape[-1]
    tn = o_ref.shape[-1]

    # --- LayerNorm once per row tile (j == 0), cached in VMEM scratch ---
    @pl.when(j == 0)
    def _():
        x = x_ref[...].astype(jnp.float32)
        a2 = a2_ref[...].astype(jnp.float32)
        b2 = b2_ref[...].astype(jnp.float32)
        # Mean / Bessel-corrected variance over the *real* feature count; the
        # zero-padded lanes are excluded from the variance via a lane mask.
        mean = jnp.sum(x, axis=-1, keepdims=True) * (1.0 / feat)
        diff = x - mean
        if feat != feat_pad:
            lane = jax.lax.broadcasted_iota(jnp.int32, (1, feat_pad), 1)
            diff_v = jnp.where(lane < feat, diff, 0.0)
        else:
            diff_v = diff
        var_unb = jnp.sum(diff_v * diff_v, axis=-1, keepdims=True) * (1.0 / (feat - 1))
        if approx_recip:
            inv = jax.lax.rsqrt(var_unb + EPS * EPS)    # single EUP pass
        else:
            inv = 1.0 / (jnp.sqrt(var_unb) + EPS)       # exact torch semantics
        # Padded lanes: a2/b2 are zero-padded, so y is exactly 0 there.
        # Zero-padded rows: diff == 0 everywhere, so y == b2 (finite) even
        # though inv ~ 1e6 -> no Inf/NaN can leak through the downcast below;
        # those rows are sliced off in the wrapper anyway.
        y_ref[...] = (a2 * (diff * inv) + b2).astype(y_ref.dtype)

    # --- sublayer: Linear(F -> F) N-tile on the MXU (f32 accumulation) ---
    z = jnp.dot(y_ref[...], w_ref[...], preferred_element_type=jnp.float32)
    z = z + wb_ref[...].astype(jnp.float32)

    # --- dropout (inverted); identity in eval mode ---
    if apply_dropout:
        z = z * mask_ref[...]        # mask is 0 or 1/(1-p), precomputed

    # --- residual: re-read x columns from the resident VMEM tile instead of
    # keeping the f32 x value live across the matmul (less spill pressure) ---
    jj = pl.multiple_of(j * tn, 128)
    x_res = x_ref[:, pl.ds(jj, tn)].astype(jnp.float32)
    o_ref[...] = (x_res + z).astype(o_ref.dtype)


def sublayer_connection(x2d, a2, b2, w, wb, *, dropout_rate=0.1, train=False,
                        seed=0, tm=None, mxu_dtype=jnp.bfloat16,
                        approx_recip=True):
    """x2d: (rows, features). a2/b2/wb: (1, features). w: (features, features)."""
    rows, feat = x2d.shape
    assert feat >= 2, "Bessel-corrected std needs features >= 2"
    apply_dropout = bool(train) and float(dropout_rate) > 0.0

    # --- lane padding to a multiple of 128 (lane-dense stores, full MXU K/N) ---
    feat_pad = _round_up(feat, 128)
    if feat_pad != feat:
        # TODO(synk): in a real transformer layer, cache the padded/casted
        # weight outside the hot path instead of padding per call.
        pc = feat_pad - feat
        x2d_k = jnp.pad(x2d, ((0, 0), (0, pc)))
        a2_k = jnp.pad(a2, ((0, 0), (0, pc)))
        b2_k = jnp.pad(b2, ((0, 0), (0, pc)))
        wb_k = jnp.pad(wb, ((0, 0), (0, pc)))
        w_k = jnp.pad(w, ((0, pc), (0, pc)))
    else:
        x2d_k, a2_k, b2_k, wb_k, w_k = x2d, a2, b2, wb, w
    w_k = w_k.astype(mxu_dtype)   # halves W HBM traffic / VMEM when bf16

    # --- row tiling ---
    itemsize = jnp.dtype(x2d.dtype).itemsize
    w_item = jnp.dtype(mxu_dtype).itemsize
    row_align = 8 if (itemsize >= 4 and w_item >= 4) else 16
    if tm is None:
        tm = 512 if feat_pad <= 2048 else 256   # cap f32 intermediates at large H
    tm_eff = max(row_align, min(int(tm), _round_up(rows, row_align)))
    tm_eff = _round_up(tm_eff, row_align)
    rows_pad = _round_up(rows, tm_eff)
    if rows_pad != rows:
        x2d_k = jnp.pad(x2d_k, ((0, rows_pad - rows), (0, 0)))

    # --- N tiling of the (F, F) weight ---
    tn = _pick_tn(feat_pad)
    n_row, n_col = rows_pad // tm_eff, feat_pad // tn
    grid = (n_row, n_col)

    # --- dropout mask (inverted dropout), generated outside the kernel ---
    if apply_dropout:
        keep = jax.random.bernoulli(jax.random.PRNGKey(int(seed)),
                                    1.0 - float(dropout_rate),
                                    (rows_pad, feat_pad))
        mask = keep.astype(jnp.float32) * (1.0 / (1.0 - float(dropout_rate)))

    # Grid-invariant operands are single-buffered; the weight/bias N-tiles are
    # double-buffered so their DMA overlaps the previous tile's matmul.
    one_buf = functools.partial(pl.BlockSpec, pipeline_mode=pl.Buffered(1))
    w_buf = one_buf if n_col == 1 else functools.partial(
        pl.BlockSpec, pipeline_mode=pl.Buffered(2))

    in_specs = [
        pl.BlockSpec((tm_eff, feat_pad), lambda i, j: (i, 0)),   # x (full feature row)
        one_buf((1, feat_pad), lambda i, j: (0, 0)),             # a_2
        one_buf((1, feat_pad), lambda i, j: (0, 0)),             # b_2
        w_buf((feat_pad, tn), lambda i, j: (0, j)),              # sublayer W N-tile
        w_buf((1, tn), lambda i, j: (0, j)),                     # sublayer bias N-tile
    ]
    args = [x2d_k, a2_k, b2_k, w_k, wb_k]
    if apply_dropout:
        in_specs.append(pl.BlockSpec((tm_eff, tn), lambda i, j: (i, j)))
        args.append(mask)

    # --- VMEM budget: generation-aware cap with compiler headroom ---
    vmem_need = (2 * tm_eff * feat_pad * itemsize      # x tile (double buffered)
                 + 2 * tm_eff * tn * itemsize          # out tile
                 + 2 * feat_pad * tn * w_item          # W tile
                 + 2 * tn * 4                          # bias tile
                 + tm_eff * feat_pad * w_item          # LayerNorm scratch
                 + 5 * tm_eff * feat_pad * 4           # f32 LayerNorm temporaries
                 + 4 * tm_eff * tn * 4                 # z + temporaries
                 + (2 * tm_eff * tn * 4 if apply_dropout else 0)
                 + 4 * feat_pad * 4)
    try:
        cap = int(pltpu.get_tpu_info().vmem_capacity_bytes)
    except Exception:
        cap = 64 * 1024 * 1024
    cap = int(0.85 * cap)                              # leave internal-scratch headroom
    vmem_limit = max(min(int(1.5 * vmem_need), cap), min(32 * 1024 * 1024, cap))

    cost = pl.CostEstimate(
        flops=2 * rows_pad * feat_pad * feat_pad + 10 * rows_pad * feat_pad,
        transcendentals=rows_pad,
        bytes_accessed=(2 * rows_pad * feat_pad * itemsize
                        + feat_pad * feat_pad * w_item
                        + (rows_pad * feat_pad * 4 if apply_dropout else 0)
                        + 3 * feat_pad * 4),
    )

    kernel = functools.partial(
        _sublayer_connection_kernel,
        feat=int(feat),
        apply_dropout=apply_dropout,
        approx_recip=bool(approx_recip),
    )

    out = pl.pallas_call(
        kernel,
        out_shape=jax.ShapeDtypeStruct((rows_pad, feat_pad), x2d.dtype),
        grid=grid,
        in_specs=in_specs,
        out_specs=pl.BlockSpec((tm_eff, tn), lambda i, j: (i, j)),
        scratch_shapes=[pltpu.VMEM((tm_eff, feat_pad), mxu_dtype)],
        compiler_params=pltpu.CompilerParams(
            dimension_semantics=("parallel", "arbitrary"),
            vmem_limit_bytes=vmem_limit),
        cost_estimate=cost,
    )(*args)

    if rows_pad != rows or feat_pad != feat:
        out = out[:rows, :feat]
    return out


def _reference(x2d, a2, b2, w, wb, *, mxu_dtype=jnp.float32):
    """Pure-JAX reference for the eval-mode forward (dropout = identity)."""
    x = x2d.astype(jnp.float32)
    feat = x.shape[-1]
    mean = jnp.mean(x, axis=-1, keepdims=True)
    diff = x - mean
    std = jnp.sqrt(jnp.sum(diff * diff, axis=-1, keepdims=True) / (feat - 1))
    y = a2 * diff / (std + EPS) + b2
    z = jnp.dot(y.astype(mxu_dtype), w.astype(mxu_dtype),
                preferred_element_type=jnp.float32) + wb
    return x + z


if __name__ == "__main__":
    # Small shapes consistent with the module: batch=2, seq=8, hidden(size)=32.
    B, S, H = 2, 8, 32
    key = jax.random.PRNGKey(0)
    kx, kw = jax.random.split(key)

    x = jax.random.normal(kx, (B, S, H), dtype=jnp.float32)

    # LayerNorm parameters exactly as in __init__: ones / zeros.
    a2 = jnp.ones((1, H), dtype=jnp.float32)
    b2 = jnp.zeros((1, H), dtype=jnp.float32)

    # Deterministic sublayer (Linear H->H) standing in for the arbitrary callable.
    w = jax.random.normal(kw, (H, H), dtype=jnp.float32) * (1.0 / jnp.sqrt(H))
    wb = jnp.zeros((1, H), dtype=jnp.float32)

    x2d = x.reshape(B * S, H)

    # 1) Eval mode, exact math (f32 MXU operands, exact 1/(std+eps)): tight check.
    out_exact = sublayer_connection(x2d, a2, b2, w, wb, dropout_rate=0.1,
                                    train=False, seed=0,
                                    mxu_dtype=jnp.float32, approx_recip=False)
    jax.block_until_ready(out_exact)
    ref_exact = _reference(x2d, a2, b2, w, wb, mxu_dtype=jnp.float32)
    assert jnp.allclose(out_exact, ref_exact, atol=1e-4, rtol=1e-4), \
        "eval-mode mismatch vs f32 reference"

    # 2) Eval mode, fast defaults (bf16 MXU operands, rsqrt-fused LayerNorm).
    out_fast = sublayer_connection(x2d, a2, b2, w, wb, dropout_rate=0.1,
                                   train=False, seed=0)
    jax.block_until_ready(out_fast)
    ref_fast = _reference(x2d, a2, b2, w, wb, mxu_dtype=jnp.bfloat16)
    assert jnp.allclose(out_fast, ref_fast, atol=5e-2, rtol=5e-2), \
        "eval-mode mismatch vs bf16 reference"

    # 3) Train mode: dropout active; ~dropout_rate of sublayer outputs zeroed.
    out_train = sublayer_connection(x2d, a2, b2, w, wb, dropout_rate=0.1,
                                    train=True, seed=123)
    jax.block_until_ready(out_train)
    dropped = float(jnp.mean(out_train == x2d))   # dropped elements: out == x exactly
    assert 0.01 < dropped < 0.4, f"dropout fraction looks wrong: {dropped}"

    out = out_fast.reshape(B, S, H)
    jax.block_until_ready(out)
    print("KERNEL_OK")
</pallas_src>

<mosaic_0001>
module attributes {stable_mosaic.version = 11 : i64} {
  func.func @_sublayer_connection_kernel(%arg0: i32, %arg1: i32, %arg2: memref<16x128xf32, #tpu.memory_space<vmem>>, %arg3: memref<1x128xf32, #tpu.memory_space<vmem>>, %arg4: memref<1x128xf32, #tpu.memory_space<vmem>>, %arg5: memref<128x128xf32, #tpu.memory_space<vmem>>, %arg6: memref<1x128xf32, #tpu.memory_space<vmem>>, %arg7: memref<16x128xf32, #tpu.memory_space<vmem>>, %arg8: memref<16x128xf32, #tpu.memory_space<vmem>>) attributes {dimension_semantics = [#tpu.dimension_semantics<parallel>, #tpu.dimension_semantics<arbitrary>], iteration_bounds = array<i64: 1, 1>, scalar_prefetch = 0 : i64, scratch_operands = 1 : i64, tpu.core_type = #tpu.core_type<tc>, window_params = [{transform_indices = @transform_0, window_bounds = array<i64: 16, 128>}, {pipeline_mode = #tpu.pipeline_mode<synchronous>, transform_indices = @transform_1, window_bounds = array<i64: 1, 128>}, {pipeline_mode = #tpu.pipeline_mode<synchronous>, transform_indices = @transform_2, window_bounds = array<i64: 1, 128>}, {pipeline_mode = #tpu.pipeline_mode<synchronous>, transform_indices = @transform_3, window_bounds = array<i64: 128, 128>}, {pipeline_mode = #tpu.pipeline_mode<synchronous>, transform_indices = @transform_4, window_bounds = array<i64: 1, 128>}, {transform_indices = @transform_5, window_bounds = array<i64: 16, 128>}]} {
    %c0_i32 = arith.constant 0 : i32
    %0 = arith.cmpi eq, %arg1, %c0_i32 : i32
    %1 = arith.extui %0 : i1 to i32
    %c0_i32_0 = arith.constant 0 : i32
    %2 = arith.cmpi ne, %1, %c0_i32_0 : i32
    scf.if %2 {
      %c0_9 = arith.constant 0 : index
      %c0_10 = arith.constant 0 : index
      %15 = vector.load %arg2[%c0_9, %c0_10] : memref<16x128xf32, #tpu.memory_space<vmem>>, vector<16x128xf32>
      %c0_11 = arith.constant 0 : index
      %c0_12 = arith.constant 0 : index
      %16 = vector.load %arg3[%c0_11, %c0_12] : memref<1x128xf32, #tpu.memory_space<vmem>>, vector<1x128xf32>
      %c0_13 = arith.constant 0 : index
      %c0_14 = arith.constant 0 : index
      %17 = vector.load %arg4[%c0_13, %c0_14] : memref<1x128xf32, #tpu.memory_space<vmem>>, vector<1x128xf32>
      %cst_15 = arith.constant dense<0.000000e+00> : vector<16xf32>
      %18 = vector.multi_reduction <add>, %15, %cst_15 [1] : vector<16x128xf32> to vector<16xf32>
      %19 = vector.shape_cast %18 : vector<16xf32> to vector<16x1xf32>
      %cst_16 = arith.constant 3.125000e-02 : f32
      %20 = vector.broadcast %cst_16 : f32 to vector<16x1xf32>
      %21 = arith.mulf %19, %20 : vector<16x1xf32>
      %22 = vector.broadcast %21 : vector<16x1xf32> to vector<16x128xf32>
      %23 = arith.subf %15, %22 : vector<16x128xf32>
      %24 = tpu.iota {dimensions = array<i32: 1>} : vector<1x128xi32>
      %c32_i32 = arith.constant 32 : i32
      %25 = vector.broadcast %c32_i32 : i32 to vector<1x128xi32>
      %26 = arith.cmpi slt, %24, %25 : vector<1x128xi32>
      %cst_17 = arith.constant 0.000000e+00 : f32
      %27 = vector.shape_cast %26 : vector<1x128xi1> to vector<1x128xi1>
      %28 = vector.broadcast %27 : vector<1x128xi1> to vector<16x128xi1>
      %29 = vector.broadcast %cst_17 : f32 to vector<16x128xf32>
      %30 = arith.select %28, %23, %29 : vector<16x128xi1>, vector<16x128xf32>
      %31 = arith.mulf %30, %30 : vector<16x128xf32>
      %cst_18 = arith.constant dense<0.000000e+00> : vector<16xf32>
      %32 = vector.multi_reduction <add>, %31, %cst_18 [1] : vector<16x128xf32> to vector<16xf32>
      %33 = vector.shape_cast %32 : vector<16xf32> to vector<16x1xf32>
      %cst_19 = arith.constant 0.0322580636 : f32
      %34 = vector.broadcast %cst_19 : f32 to vector<16x1xf32>
      %35 = arith.mulf %33, %34 : vector<16x1xf32>
      %36 = math.sqrt %35 : vector<16x1xf32>
      %cst_20 = arith.constant 9.99999997E-7 : f32
      %37 = vector.broadcast %cst_20 : f32 to vector<16x1xf32>
      %38 = arith.addf %36, %37 : vector<16x1xf32>
      %cst_21 = arith.constant 1.000000e+00 : f32
      %39 = vector.broadcast %cst_21 : f32 to vector<16x1xf32>
      %40 = arith.divf %39, %38 : vector<16x1xf32>
      %41 = vector.broadcast %40 : vector<16x1xf32> to vector<16x128xf32>
      %42 = arith.mulf %23, %41 : vector<16x128xf32>
      %43 = vector.broadcast %16 : vector<1x128xf32> to vector<16x128xf32>
      %44 = arith.mulf %43, %42 : vector<16x128xf32>
      %45 = vector.broadcast %17 : vector<1x128xf32> to vector<16x128xf32>
      %46 = arith.addf %44, %45 : vector<16x128xf32>
      %c0_22 = arith.constant 0 : index
      %c0_23 = arith.constant 0 : index
      %47 = vector.load %arg8[%c0_22, %c0_23] : memref<16x128xf32, #tpu.memory_space<vmem>>, vector<16x128xf32>
      tpu.vector_store %arg8[%c0_22, %c0_23], %46 {strides = array<i32>} : memref<16x128xf32, #tpu.memory_space<vmem>>, vector<16x128xf32>,
    } else {
    }
    %c0 = arith.constant 0 : index
    %c0_1 = arith.constant 0 : index
    %3 = vector.load %arg8[%c0, %c0_1] : memref<16x128xf32, #tpu.memory_space<vmem>>, vector<16x128xf32>
    %c0_2 = arith.constant 0 : index
    %c0_3 = arith.constant 0 : index
    %4 = vector.load %arg5[%c0_2, %c0_3] : memref<128x128xf32, #tpu.memory_space<vmem>>, vector<128x128xf32>
    %cst = arith.constant dense<0.000000e+00> : vector<16x128xf32>
    %5 = tpu.matmul %3, %4, %cst {dimension_numbers = #tpu.dot_dimension_numbers<[1], [0], [0], [1], [0, 0, 1, 1], [], []>} : vector<16x128xf32>, vector<128x128xf32>, vector<16x128xf32> -> vector<16x128xf32>
    %c0_4 = arith.constant 0 : index
    %c0_5 = arith.constant 0 : index
    %6 = vector.load %arg6[%c0_4, %c0_5] : memref<1x128xf32, #tpu.memory_space<vmem>>, vector<1x128xf32>
    %7 = vector.broadcast %6 : vector<1x128xf32> to vector<16x128xf32>
    %8 = arith.addf %5, %7 : vector<16x128xf32>
    %c128_i32 = arith.constant 128 : i32
    %9 = arith.muli %arg1, %c128_i32 : i32
    %10 = tpu.assume_multiple %9, 128 : i32
    %c0_6 = arith.constant 0 : index
    %11 = arith.index_cast %10 : i32 to index
    %12 = vector.load %arg2[%c0_6, %11] : memref<16x128xf32, #tpu.memory_space<vmem>>, vector<16x128xf32>
    %13 = arith.addf %12, %8 : vector<16x128xf32>
    %c0_7 = arith.constant 0 : index
    %c0_8 = arith.constant 0 : index
    %14 = vector.load %arg7[%c0_7, %c0_8] : memref<16x128xf32, #tpu.memory_space<vmem>>, vector<16x128xf32>
    tpu.vector_store %arg7[%c0_7, %c0_8], %13 {strides = array<i32>} : memref<16x128xf32, #tpu.memory_space<vmem>>, vector<16x128xf32>,
    return
  }
  func.func @transform_0(%arg0: i32, %arg1: i32) -> (i32, i32) {
    %c0_i32 = arith.constant 0 : i32
    %c0_i32_0 = arith.constant 0 : i32
    return %arg0, %c0_i32 : i32, i32
  }
  func.func @transform_1(%arg0: i32, %arg1: i32) -> (i32, i32) {
    %c0_i32 = arith.constant 0 : i32
    %c0_i32_0 = arith.constant 0 : i32
    %c0_i32_1 = arith.constant 0 : i32
    return %c0_i32, %c0_i32_0 : i32, i32
  }
  func.func @transform_2(%arg0: i32, %arg1: i32) -> (i32, i32) {
    %c0_i32 = arith.constant 0 : i32
    %c0_i32_0 = arith.constant 0 : i32
    %c0_i32_1 = arith.constant 0 : i32
    return %c0_i32, %c0_i32_0 : i32, i32
  }
  func.func @transform_3(%arg0: i32, %arg1: i32) -> (i32, i32) {
    %c0_i32 = arith.constant 0 : i32
    %c0_i32_0 = arith.constant 0 : i32
    return %c0_i32, %arg1 : i32, i32
  }
  func.func @transform_4(%arg0: i32, %arg1: i32) -> (i32, i32) {
    %c0_i32 = arith.constant 0 : i32
    %c0_i32_0 = arith.constant 0 : i32
    return %c0_i32, %arg1 : i32, i32
  }
  func.func @transform_5(%arg0: i32, %arg1: i32) -> (i32, i32) {
    %c0_i32 = arith.constant 0 : i32
    return %arg0, %arg1 : i32, i32
  }
}

</mosaic_0001>

<bundles_post_ra>
// kernel: tpu_custom_call.1
= control target key start
LH: loop header
LB: loop body
LE: loop exit
PB: predicated region body
PF: predicated region fallthrough
CT: control target
= control target key end

     0   :  { %10 = vsyncpa [#allocation4], 0  ;;  %s529_s0 = inlined_call_operand.hbm [shape: f32[16,128], index: 0, kind: input, shape index: {}]   ;;  %s530_s1 = inlined_call_operand.vmem [shape: f32[1,128], index: 1, kind: input, shape index: {}]   ;;  %s531_s2 = inlined_call_operand.vmem [shape: f32[1,128], index: 2, kind: input, shape index: {}]   ;;  %s532_s3 = inlined_call_operand.hbm [shape: f32[128,128], index: 3, kind: input, shape index: {}]   ;;  %s533_s4 = inlined_call_operand.vmem [shape: f32[1,128], index: 4, kind: input, shape index: {}]   ;;  %s534_s5 = inlined_call_operand.hbm [shape: f32[16,128], index: 5, kind: output, shape index: {}]  }
   0x1   :  { %11 = vsyncpa [#allocation7], 0 }
   0x2   :  { %12 = vsyncpa [#allocation5], 0  ;;  %s422_s18 = smov [#allocation3]   ;;  %s350_s22 = scalar_lea.hbm %s529_s0, 256 }
   0x3   :  { %s18_s19 = sshll.u32 %s422_s18, 4  ;;  %p351_p0 = scmp.ne.s32.totalorder %s529_s0, %s350_s22  ;;  %s19_s19 = int_to_ptr.vmem [resolvable:$true] %s18_s19 }
   0x4   :  { %p354_p1 = scmp.lt.u32.totalorder %s350_s22, %s529_s0 }
   0x6   :  { %p356_p2 = pnand %p354_p1, %p351_p0 }
   0x8   :  { %359 = shalt.err (!%p356_p2)
}
   0x9   :  { %s360_s27 = scalar_lea.vmem %s19_s19, 256  ;;  %p365_p4 = scmp.lt.s32.totalorder %s19_s19, %s19_s19 }
   0xa   :  { %p361_p3 = scmp.ne.s32.totalorder %s19_s19, %s360_s27  ;;  %p366_p5 = scmp.lt.s32.totalorder %s360_s27, %s360_s27 }
   0xc   :  { %p367_p6 = por %p366_p5, %p365_p4 }
   0xe   :  { %p368_p7 = pnand %p367_p6, %p361_p3 }
  0x10   :  { %371 = shalt.err (!%p368_p7)
}
  0x11   :  { %s423_s28 = smov 128   ;;  %s424_s29 = smov 8  }
  0x12   :  { %24 = dma.hbm_to_vmem [thread:$0]  %s529_s0, 256, %s19_s19, [#allocation4], %s423_s28, %s423_s28, %s424_s29  }
  0x13   :  { %s425_s7 = smov [#allocation6]   ;;  %s372_s11 = scalar_lea.hbm %s532_s3, 2048 }
  0x14   :  { %s34_s8 = sshll.u32 %s425_s7, 4  ;;  %p373_p8 = scmp.ne.s32.totalorder %s532_s3, %s372_s11  ;;  %s35_s8 = int_to_ptr.vmem [resolvable:$true] %s34_s8 }
  0x15   :  { %p376_p9 = scmp.lt.u32.totalorder %s372_s11, %s532_s3 }
  0x17   :  { %p378_p10 = pnand %p376_p9, %p373_p8 }
  0x19   :  { %381 = shalt.err (!%p378_p10)
}
  0x1a   :  { %s382_s16 = scalar_lea.vmem %s35_s8, 2048  ;;  %p387_p12 = scmp.lt.s32.totalorder %s35_s8, %s35_s8 }
  0x1b   :  { %p383_p11 = scmp.ne.s32.totalorder %s35_s8, %s382_s16  ;;  %p388_p13 = scmp.lt.s32.totalorder %s382_s16, %s382_s16 }
  0x1d   :  { %p389_p0 = por %p388_p13, %p387_p12 }
  0x1f   :  { %p390_p1 = pnand %p389_p0, %p383_p11 }
  0x21   :  { %393 = shalt.err (!%p390_p1)
}
  0x22   :  { %40 = dma.hbm_to_vmem [thread:$0]  %s532_s3, 2048, %s35_s8, [#allocation7], %s423_s28, %s423_s28, %s424_s29  }
  0x23   :  { %416 = dma.done.wait [#allocation4], 256  }
  0x24   :  { %417 = vsyncadd [#allocation4], 4294967040 }
  0x25   :  { %418 = dma.done.wait [#allocation7], 2048  }
  0x26   :  { %419 = vsyncadd [#allocation7], 4294965248  ;;  %v487_v0 = vld [vmem:[#allocation3] sm:$0xff]  ;;  %v490_v1 = vld [vmem:[#allocation3 + $0x8] sm:$0xff]  ;;  %v65_v2 = vlaneseq }
  0x27   :  { %57 = vadd.xlane.f32.xlu0 %v487_v0  ;;  %v122_v14 = vld [vmem:[#allocation6] sm:$0xff]  ;;  %v123_v15 = vld [vmem:[#allocation6 + $0x8] sm:$0xff]  ;;  %v124_v17 = vld [vmem:[#allocation6 + $0x10] sm:$0xff] }
  0x28   :  { %v66_v3 = vand.u32 127, %v65_v2  ;;  %v305_v16 = vpack.c.bf16 %v123_v15, %v122_v14  ;;  %v125_v18 = vld [vmem:[#allocation6 + $0x18] sm:$0xff]  ;;  %v126_v20 = vld [vmem:[#allocation6 + $0x20] sm:$0xff]  ;;  %v127_v21 = vld [vmem:[#allocation6 + $0x28] sm:$0xff] }
  0x29   :  { %v309_v19 = vpack.c.bf16 %v125_v18, %v124_v17  ;;  %v313_v22 = vpack.c.bf16 %v127_v21, %v126_v20  ;;  %v128_v23 = vld [vmem:[#allocation6 + $0x30] sm:$0xff]  ;;  %v129_v24 = vld [vmem:[#allocation6 + $0x38] sm:$0xff]  ;;  %v130_v26 = vld [vmem:[#allocation6 + $0x40] sm:$0xff] }
  0x2a   :  { %vm67_vm0 = vcmp.lt.s32.totalorder %v66_v3, 32  ;;  %306 = vmatprep.subr.bf16.mxu0 %v305_v16  ;;  %v317_v25 = vpack.c.bf16 %v129_v24, %v128_v23  ;;  %v131_v27 = vld [vmem:[#allocation6 + $0x48] sm:$0xff]  ;;  %v132_v28 = vld [vmem:[#allocation6 + $0x50] sm:$0xff]  ;;  %v133_v30 = vld [vmem:[#allocation6 + $0x58] sm:$0xff] }
  0x2b   :  { %59 = vadd.xlane.f32.xlu0 %v490_v1  ;;  %308 = vmatpush3.bf16.msra.mxu0 %v305_v16  ;;  %v321_v29 = vpack.c.bf16 %v131_v27, %v130_v26  ;;  %v325_v31 = vpack.c.bf16 %v133_v30, %v132_v28  ;;  %v134_v32 = vld [vmem:[#allocation6 + $0x60] sm:$0xff]  ;;  %v135_v33 = vld [vmem:[#allocation6 + $0x68] sm:$0xff]  ;;  %v136_v35 = vld [vmem:[#allocation6 + $0x70] sm:$0xff] }
  0x2c   :  { %310 = vmatprep.subr.bf16.mxu0 %v309_v19  ;;  %v329_v34 = vpack.c.bf16 %v135_v33, %v134_v32  ;;  %v137_v36 = vld [vmem:[#allocation6 + $0x78] sm:$0xff]  ;;  %v249_v55 = vld [vmem:[%s530_s1] ss:$0 sm:$0xff]  ;;  %s426_s1 = smov [#allocation8]  }
  0x2d   :  { %v333_v37 = vpack.c.bf16 %v137_v36, %v136_v35  ;;  %v250_v57 = vld [vmem:[%s531_s2] ss:$0 sm:$0xff]  ;;  %s235_s23 = sshll.u32 %s426_s1, 4  ;;  %s236_s23 = int_to_ptr.vmem [resolvable:$true] %s235_s23 }
  0x2e   :  { %v251_v2 = vld [vmem:[%s533_s4] ss:$0 sm:$0xff]  ;;  %s394_s2 = scalar_lea.vmem %s236_s23, 256  ;;  %p399_p3 = scmp.lt.s32.totalorder %s236_s23, %s236_s23 }
  0x2f   :  { %312 = vmatpush3.bf16.msra.mxu0 %v309_v19  ;;  %p395_p2 = scmp.ne.s32.totalorder %s236_s23, %s394_s2  ;;  %p400_p4 = scmp.lt.s32.totalorder %s394_s2, %s394_s2 }
  0x30   :  { %314 = vmatprep.subr.bf16.mxu0 %v313_v22 }
  0x31   :  { %p401_p5 = por %p400_p4, %p399_p3 }
  0x33   :  { %316 = vmatpush3.bf16.msra.mxu0 %v313_v22  ;;  %p402_p6 = pnand %p401_p5, %p395_p2 }
  0x34   :  { %318 = vmatprep.subr.bf16.mxu0 %v317_v25 }
  0x37   :  { %320 = vmatpush3.bf16.msra.mxu0 %v317_v25 }
  0x38   :  { %322 = vmatprep.subr.bf16.mxu0 %v321_v29 }
  0x3b   :  { %324 = vmatpush3.bf16.msra.mxu0 %v321_v29 }
  0x3c   :  { %326 = vmatprep.subr.bf16.mxu0 %v325_v31 }
  0x3f   :  { %328 = vmatpush3.bf16.msra.mxu0 %v325_v31 }
  0x40   :  { %330 = vmatprep.subr.bf16.mxu0 %v329_v34 }
  0x43   :  { %332 = vmatpush3.bf16.msra.mxu0 %v329_v34 }
  0x44   :  { %334 = vmatprep.subr.bf16.mxu0 %v333_v37 }
  0x47   :  { %336 = vmatpush3.bf16.msra.mxu0 %v333_v37 }
  0xb4   :  { %v58_v4 = vpop.xlane.xlu0 %57 }
  0xb5   :  { %v61_v5 = vmul.f32 0.03125, %v58_v4 }
  0xb7   :  { %v494_v6 = vsub.f32 %v487_v0, %v61_v5 }
  0xb8   :  { %v60_v7 = vpop.xlane.xlu0 %59 }
  0xb9   :  { %v62_v8 = vmul.f32 0.03125, %v60_v7  ;;  %v70_v9 = vsel %vm67_vm0, %v494_v6, 0.0 }
  0xba   :  { %v72_v10 = vmul.f32 %v70_v9, %v70_v9 }
  0xbb   :  { %v498_v11 = vsub.f32 %v490_v1, %v62_v8 }
  0xbc   :  { %74 = vadd.xlane.f32.xlu1 %v72_v10 }
  0xbd   :  { %v71_v12 = vsel %vm67_vm0, %v498_v11, 0.0 }
  0xbe   :  { %v73_v13 = vmul.f32 %v71_v12, %v71_v12 }
  0xc0   :  { %76 = vadd.xlane.f32.xlu1 %v73_v13 }
 0x149   :  { %v75_v38 = vpop.xlane.xlu1 %74 }
 0x14a   :  { %v78_v39 = vmul.f32 0.032258064, %v75_v38 }
 0x14c   :  { %342 = vrsqrt.f32 %v78_v39  ;;  %vm82_vm1 = vcmp.eq.f32.partialorder %v78_v39, inf  ;;  %v85_v44 = vand.u32 2147483648, %v78_v39  ;;  %vm84_vm2 = vcmp.eq.f32.partialorder %v78_v39, 0.0 }
 0x14d   :  { %v77_v40 = vpop.xlane.xlu1 %76 }
 0x14e   :  { %v79_v41 = vmul.f32 0.032258064, %v77_v40 }
 0x150   :  { %344 = vrsqrt.f32 %v79_v41  ;;  %vm89_vm3 = vcmp.eq.f32.partialorder %v79_v41, inf  ;;  %v92_v50 = vand.u32 2147483648, %v79_v41  ;;  %vm91_vm4 = vcmp.eq.f32.partialorder %v79_v41, 0.0 }
 0x156   :  { %v343_v42 = vpop.eup %342 }
 0x157   :  { %v81_v43 = vmul.f32 %v343_v42, %v78_v39 }
 0x159   :  { %v83_v45 = vsel %vm82_vm1, %v78_v39, %v81_v43 }
 0x15a   :  { %v345_v46 = vpop.eup %344  ;;  %v86_v47 = vsel %vm84_vm2, %v85_v44, %v83_v45 }
 0x15b   :  { %v88_v48 = vmul.f32 %v345_v46, %v79_v41  ;;  %v94_v49 = vadd.f32 1e-06, %v86_v47 }
 0x15d   :  { %v90_v51 = vsel %vm89_vm3, %v79_v41, %v88_v48  ;;  %346 = vrcp.f32 %v94_v49 }
 0x15e   :  { %v93_v52 = vsel %vm91_vm4, %v92_v50, %v90_v51 }
 0x15f   :  { %v95_v53 = vadd.f32 1e-06, %v93_v52 }
 0x161   :  { %348 = vrcp.f32 %v95_v53 }
 0x167   :  { %v347_v54 = vpop.eup %346 }
 0x168   :  { %v100_v56 = vmul.f32 %v347_v54, %v494_v6 }
 0x16a   :  { %v108_v58 = vmul.f32 %v249_v55, %v100_v56 }
 0x16b   :  { %v349_v59 = vpop.eup %348 }
 0x16c   :  { %v101_v60 = vmul.f32 %v349_v59, %v498_v11  ;;  %v116_v61 = vadd.f32 %v250_v57, %v108_v58 }
 0x16e   :  { %v109_v62 = vmul.f32 %v249_v55, %v101_v60  ;;  %302 = vmatprep.mubr.f32.mxu0 %v116_v61 }
 0x170   :  { %v117_v63 = vadd.f32 %v250_v57, %v109_v62 }
 0x172   :  { %303 = vmatmul.mubr.f32.vlgmr.msra.gmra.mrb[0].mxu0 %v117_v63 }
 0x245   :  { %v304_v3 = vpop.f32.mrb[0].mxu0 }
 0x246   :  { %v217_v4 = vadd.f32 %v304_v3, %v251_v2  ;;  %v211_v5 = vpop.f32.mrb[1].mxu0 }
 0x247   :  { %v212_v6 = vadd.f32 %v251_v2, %v211_v5 }
 0x248   :  { %v227_v7 = vadd.f32 %v217_v4, %v490_v1 }
 0x249   :  { %v226_v8 = vadd.f32 %v212_v6, %v487_v0 }
 0x24a   :  { %229 = vst [vmem:[#allocation8 + $0x8] sm:$0xff] %v227_v7 }
 0x24b   :  { %228 = vst [vmem:[#allocation8] sm:$0xff] %v226_v8 }
 0x24c   :  { %405 = shalt.err (!%p402_p6)
}
 0x24d   :  { %s406_s25 = scalar_lea.hbm %s534_s5, 256 }
 0x24e   :  { %p407_p7 = scmp.ne.s32.totalorder %s534_s5, %s406_s25  ;;  %p410_p8 = scmp.lt.u32.totalorder %s406_s25, %s534_s5 }
 0x250   :  { %p412_p9 = pnand %p410_p8, %p407_p7 }
 0x252   :  { %415 = shalt.err (!%p412_p9)
}
 0x253   :  { %241 = dma.vmem_to_hbm [thread:$0]  %s236_s23, 256, %s534_s5, [#allocation5], %s423_s28, %s423_s28, %s424_s29  }
 0x254   :  { %420 = dma.done.wait [#allocation5], 256  }
 0x255   :  { %421 = vsyncadd [#allocation5], 4294967040 }
 0x256   :  { %245 = vsyncpa [#allocation4], 1 }
 0x257   :  { %246 = vsyncpa [#allocation7], 1 }
 0x258   :  { %247 = vsyncpa [#allocation5], 1 }

</bundles_post_ra>
